<compile_context>
chip_gen: v6e
topology: v6e:2x2x1
jax: 0.10.0
libtpu: 0.0.40
codegen_flags: <defaults>
</compile_context>

<pallas_src>
import jax
import jax.numpy as jnp
from jax.experimental import pallas as pl
from jax.experimental.pallas import tpu as pltpu


# ----------------------------------------------------------------------------
# Kernel 1: per-graph pairwise squared distances (diagonal masked in-kernel)
# ----------------------------------------------------------------------------
def _dist_kernel(x_ref, d_ref):
    x = x_ref[0]                                                  # (N, F)
    N = x.shape[0]
    sq = jnp.sum(x * x, axis=-1, keepdims=True)                   # (N, 1)
    # x @ x.T without materializing a transpose: contract feature axis of both operands.
    g = jax.lax.dot_general(x, x, (((1,), (1,)), ((), ())),
                            preferred_element_type=jnp.float32)   # (N, N)  MXU
    d = sq + sq.T - 2.0 * g
    r = jax.lax.broadcasted_iota(jnp.int32, (N, N), 0)
    c = jax.lax.broadcasted_iota(jnp.int32, (N, N), 1)
    # clamp cancellation negatives, and +inf on the diagonal (no self loops)
    d_ref[0] = jnp.where(r == c, jnp.float32(jnp.inf), jnp.maximum(d, 0.0))


def pairwise_sq_dist(x):
    B, N, F = x.shape
    return pl.pallas_call(
        _dist_kernel,
        out_shape=jax.ShapeDtypeStruct((B, N, N), jnp.float32),
        grid_spec=pltpu.PrefetchScalarGridSpec(
            num_scalar_prefetch=0,
            grid=(B,),
            in_specs=[pl.BlockSpec((1, N, F), lambda b: (b, 0, 0))],
            out_specs=pl.BlockSpec((1, N, N), lambda b: (b, 0, 0)),
        ),
        compiler_params=pltpu.CompilerParams(dimension_semantics=("parallel",)),
    )(x)


# ----------------------------------------------------------------------------
# Kernel 2: fused stack of L EdgeConv layers (per-graph)
#   Built once per graph (constant across layers):
#     oh  (NK, N): one-hot gather matrix from int32 neighbor indices (in-kernel iota compare)
#     agg (N, NK): 'add' aggregation matrix (edges are node-major contiguous, K per node)
#   Per layer l (weights indexed statically from stacked (L, ...) refs):
#     xj   = oh @ x                                  (neighbor gather, MXU)
#     h    = repeat(x @ (W1a-W1b)) + xj @ W1b + b1   == [x_i, x_j - x_i] @ W1 + b1
#     h    = leaky_relu(h) @ W2 + b2 ; h = leaky_relu(h) @ W3 + b3
#     x    = agg @ h                                 ('add' aggregation, MXU)
#   Only the final x is stored (single narrow-lane store per graph).
# ----------------------------------------------------------------------------
def _edgeconv_stack_kernel(idx_ref, x_ref,
                           w1c_ref, w1b_ref, b1_ref, w2_ref, b2_ref, w3_ref, b3_ref,
                           o_ref):
    _, N, K = idx_ref.shape
    L = w1c_ref.shape[0]
    NK = N * K

    idx = idx_ref[0]                                              # (N, K) int32
    x = x_ref[0]                                                  # (N, F) f32

    # One-hot gather matrix, built in VMEM — no O(N^2*k) HBM array, no per-layer re-DMA.
    col = jax.lax.broadcasted_iota(jnp.int32, (N, K, N), 2)
    oh = (col == idx[:, :, None]).astype(jnp.float32).reshape(NK, N)      # (NK, N)

    # Aggregation matrix agg[i, e] = 1 iff i*K <= e < (i+1)*K (no integer division needed).
    e_idx = jax.lax.broadcasted_iota(jnp.int32, (N, NK), 1)
    i_lo = jax.lax.broadcasted_iota(jnp.int32, (N, NK), 0) * K
    agg = ((e_idx >= i_lo) & (e_idx < i_lo + K)).astype(jnp.float32)       # (N, NK)

    # Static unroll over layers (n_layers is small); weights sliced statically from (L,...) refs.
    for l in range(L):
        xj = jnp.dot(oh, x, preferred_element_type=jnp.float32)           # (NK, F)
        xi_c = jnp.dot(x, w1c_ref[l], preferred_element_type=jnp.float32)  # (N, H)
        H = xi_c.shape[-1]
        # Replicate per-node term to per-edge rows without a (NK,N)@(N,H) matmul.
        xi_rep = jnp.broadcast_to(xi_c[:, None, :], (N, K, H)).reshape(NK, H)
        h = (xi_rep
             + jnp.dot(xj, w1b_ref[l], preferred_element_type=jnp.float32)
             + b1_ref[l])                                                  # (NK, H)
        h = jnp.where(h > 0, h, 0.2 * h)                                   # LeakyReLU(0.2)
        h = jnp.dot(h, w2_ref[l], preferred_element_type=jnp.float32) + b2_ref[l]
        h = jnp.where(h > 0, h, 0.2 * h)
        h = jnp.dot(h, w3_ref[l], preferred_element_type=jnp.float32) + b3_ref[l]  # (NK, F)
        x = jnp.dot(agg, h, preferred_element_type=jnp.float32)           # (N, F)

    o_ref[0] = x


def edgeconv_stack(x, idx, stacked_params):
    """x: (B, N, F) f32, idx: (B, N, K) int32, stacked_params: tuple of (L, ...) arrays."""
    B, N, F = x.shape
    K = idx.shape[2]
    w1c, w1b, b1, w2, b2, w3, b3 = stacked_params
    L, _, H = w2.shape

    def const(shape):
        return pl.BlockSpec(shape, lambda b, _s=shape: (0,) * len(_s))

    return pl.pallas_call(
        _edgeconv_stack_kernel,
        out_shape=jax.ShapeDtypeStruct((B, N, F), jnp.float32),
        grid_spec=pltpu.PrefetchScalarGridSpec(
            num_scalar_prefetch=0,
            grid=(B,),
            in_specs=[
                pl.BlockSpec((1, N, K), lambda b: (b, 0, 0)),   # neighbor indices (int32)
                pl.BlockSpec((1, N, F), lambda b: (b, 0, 0)),   # x
                const((L, F, H)),                               # W1c = W1a - W1b, stacked
                const((L, F, H)),                               # W1b
                const((L, 1, H)),                               # b1
                const((L, H, H)),                               # W2
                const((L, 1, H)),                               # b2
                const((L, H, F)),                               # W3
                const((L, 1, F)),                               # b3
            ],
            out_specs=pl.BlockSpec((1, N, F), lambda b: (b, 0, 0)),
        ),
        compiler_params=pltpu.CompilerParams(dimension_semantics=("parallel",)),
    )(idx, x, w1c, w1b, b1, w2, b2, w3, b3)


# ----------------------------------------------------------------------------
# Parameter construction (deterministic, synthetic)
# ----------------------------------------------------------------------------
def init_ffn_params(key, n_features, hidden):
    F, H = n_features, hidden
    k1, k2, k3 = jax.random.split(key, 3)
    w1 = jax.random.normal(k1, (2 * F, H), jnp.float32) / jnp.sqrt(2.0 * F)
    b1 = jnp.zeros((1, H), jnp.float32)
    w2 = jax.random.normal(k2, (H, H), jnp.float32) / jnp.sqrt(1.0 * H)
    b2 = jnp.zeros((1, H), jnp.float32)
    w3 = jax.random.normal(k3, (H, F), jnp.float32) / jnp.sqrt(1.0 * H)
    b3 = jnp.zeros((1, F), jnp.float32)
    w1a, w1b = w1[:F], w1[F:]
    # [x_i, x_j - x_i] @ W1 = x_i @ (W1a - W1b) + x_j @ W1b
    return (w1a - w1b, w1b, b1, w2, b2, w3, b3)


# ----------------------------------------------------------------------------
# Full forward
# ----------------------------------------------------------------------------
def build_knn_idx(x, k):
    """Batch-aware kNN (no self loops). Returns (B, N, k) int32 neighbor indices."""
    B, N, F = x.shape
    assert k <= N - 1, "k nearest neighbors without self loops requires N >= k + 1"
    d = pairwise_sq_dist(x)                     # Pallas kernel; diagonal already +inf
    _, idx = jax.lax.top_k(-d, k)               # (B, N, k)
    return idx.astype(jnp.int32)


def generator_forward(random_vector, layer_params, k=25):
    """random_vector: (B, N, F) float32. Returns updated node features (B, N, F)."""
    x = random_vector.astype(jnp.float32)
    idx = build_knn_idx(x, k)
    # Stack per-layer FFN params -> one fused pallas_call over all layers.
    n_params = len(layer_params[0])
    stacked = tuple(jnp.stack([p[i] for p in layer_params], axis=0) for i in range(n_params))
    return edgeconv_stack(x, idx, stacked)


# ----------------------------------------------------------------------------
# Pure-JAX reference (for correctness check)
# ----------------------------------------------------------------------------
def reference_edgeconv_stack(x, idx, layer_params):
    out = x
    for (w1c, w1b, b1, w2, b2, w3, b3) in layer_params:
        xj = jax.vmap(lambda xb, ib: xb[ib])(out, idx)            # (B, N, k, F)
        xi = out[:, :, None, :]                                   # (B, N, 1, F)
        h = xi @ w1c + xj @ w1b + b1                              # (B, N, k, H)
        h = jnp.where(h > 0, h, 0.2 * h)
        h = h @ w2 + b2
        h = jnp.where(h > 0, h, 0.2 * h)
        h = h @ w3 + b3                                           # (B, N, k, F)
        out = jnp.sum(h, axis=2)                                  # 'add' aggregation
    return out


if __name__ == "__main__":
    # Small, module-consistent shapes: batch=2 graphs, 32 points each (>= k+1), 4 features.
    B, N, F, H = 2, 32, 4, 32
    N_LAYERS, K = 2, 25

    key = jax.random.PRNGKey(0)
    k_in, *k_layers = jax.random.split(key, 1 + N_LAYERS)
    random_vector = jax.random.normal(k_in, (B, N, F), jnp.float32)
    layer_params = [init_ffn_params(kl, F, H) for kl in k_layers]

    out = generator_forward(random_vector, layer_params, k=K)
    out = jax.block_until_ready(out)
    assert out.shape == (B, N, F)
    assert bool(jnp.all(jnp.isfinite(out)))

    # Numerical check against a pure-JAX reference (same kNN indices).
    idx = build_knn_idx(random_vector, K)
    ref = reference_edgeconv_stack(random_vector, idx, layer_params)
    assert bool(jnp.allclose(out, ref, rtol=1e-3, atol=1e-3)), "mismatch vs JAX reference"

    print("KERNEL_OK")
</pallas_src>

<mosaic_0001>
module attributes {stable_mosaic.version = 11 : i64} {
  func.func @_dist_kernel(%arg0: i32, %arg1: memref<1x32x4xf32, #tpu.memory_space<vmem>>, %arg2: memref<1x32x32xf32, #tpu.memory_space<vmem>>) attributes {dimension_semantics = [#tpu.dimension_semantics<parallel>], iteration_bounds = array<i64: 2>, scalar_prefetch = 0 : i64, scratch_operands = 0 : i64, tpu.core_type = #tpu.core_type<tc>, window_params = [{transform_indices = @transform_0, window_bounds = array<i64: 1, 32, 4>}, {transform_indices = @transform_1, window_bounds = array<i64: 1, 32, 32>}]} {
    %c0 = arith.constant 0 : index
    %c0_0 = arith.constant 0 : index
    %c0_1 = arith.constant 0 : index
    %0 = vector.load %arg1[%c0, %c0_0, %c0_1] : memref<1x32x4xf32, #tpu.memory_space<vmem>>, vector<1x32x4xf32>
    %1 = vector.shape_cast %0 : vector<1x32x4xf32> to vector<32x4xf32>
    %2 = arith.mulf %1, %1 : vector<32x4xf32>
    %cst = arith.constant dense<0.000000e+00> : vector<32xf32>
    %3 = vector.multi_reduction <add>, %2, %cst [1] : vector<32x4xf32> to vector<32xf32>
    %4 = vector.shape_cast %3 : vector<32xf32> to vector<32x1xf32>
    %cst_2 = arith.constant dense<0.000000e+00> : vector<32x32xf32>
    %5 = tpu.matmul %1, %1, %cst_2 {dimension_numbers = #tpu.dot_dimension_numbers<[1], [1], [0], [0], [0, 0, 1, 0], [], []>} : vector<32x4xf32>, vector<32x4xf32>, vector<32x32xf32> -> vector<32x32xf32>
    %6 = tpu.transpose %4, [1, 0] : vector<32x1xf32> -> vector<1x32xf32>
    %7 = vector.broadcast %4 : vector<32x1xf32> to vector<32x32xf32>
    %8 = vector.broadcast %6 : vector<1x32xf32> to vector<32x32xf32>
    %9 = arith.addf %7, %8 : vector<32x32xf32>
    %cst_3 = arith.constant 2.000000e+00 : f32
    %10 = vector.broadcast %cst_3 : f32 to vector<32x32xf32>
    %11 = arith.mulf %10, %5 : vector<32x32xf32>
    %12 = arith.subf %9, %11 : vector<32x32xf32>
    %13 = tpu.iota {dimensions = array<i32: 0>} : vector<32x32xi32>
    %14 = tpu.iota {dimensions = array<i32: 1>} : vector<32x32xi32>
    %15 = arith.cmpi eq, %13, %14 : vector<32x32xi32>
    %cst_4 = arith.constant 0.000000e+00 : f32
    %16 = vector.broadcast %cst_4 : f32 to vector<32x32xf32>
    %17 = arith.maximumf %12, %16 : vector<32x32xf32>
    %cst_5 = arith.constant 0x7F800000 : f32
    %18 = vector.broadcast %cst_5 : f32 to vector<32x32xf32>
    %19 = arith.select %15, %18, %17 : vector<32x32xi1>, vector<32x32xf32>
    %c0_6 = arith.constant 0 : index
    %c0_7 = arith.constant 0 : index
    %c0_8 = arith.constant 0 : index
    %20 = vector.load %arg2[%c0_6, %c0_7, %c0_8] : memref<1x32x32xf32, #tpu.memory_space<vmem>>, vector<1x32x32xf32>
    %21 = vector.shape_cast %20 : vector<1x32x32xf32> to vector<32x32xf32>
    %22 = vector.shape_cast %19 : vector<32x32xf32> to vector<1x32x32xf32>
    tpu.vector_store %arg2[%c0_6, %c0_7, %c0_8], %22 {strides = array<i32>} : memref<1x32x32xf32, #tpu.memory_space<vmem>>, vector<1x32x32xf32>,
    return
  }
  func.func @transform_0(%arg0: i32) -> (i32, i32, i32) {
    %c0_i32 = arith.constant 0 : i32
    %c0_i32_0 = arith.constant 0 : i32
    %c0_i32_1 = arith.constant 0 : i32
    return %arg0, %c0_i32, %c0_i32_0 : i32, i32, i32
  }
  func.func @transform_1(%arg0: i32) -> (i32, i32, i32) {
    %c0_i32 = arith.constant 0 : i32
    %c0_i32_0 = arith.constant 0 : i32
    %c0_i32_1 = arith.constant 0 : i32
    return %arg0, %c0_i32, %c0_i32_0 : i32, i32, i32
  }
}

</mosaic_0001>

<bundles_post_ra>
// kernel: tpu_custom_call.1
= control target key start
LH: loop header
LB: loop body
LE: loop exit
PB: predicated region body
PF: predicated region fallthrough
CT: control target
= control target key end

     0   :  { %6 = vsyncpa [#allocation3], 0  ;;  %s684_s0 = inlined_call_operand.vmem [shape: f32[2,32,4], index: 0, kind: input, shape index: {}]   ;;  %s685_s1 = inlined_call_operand.hbm [shape: f32[2,32,32], index: 1, kind: output, shape index: {}]  }
   0x1   :  { %8 = vsyncpa [#allocation3 + $0x1], 0  ;;  %s550_s6 = smov 0   ;;  %s552_s7 = smov 0  }
   0x2   :  { %s554_s8 = smov 0   ;;  %s556_s9 = smov 0  }
   0x3 LB: > { %s571_s10 = sadd.s32 4294967295, %s535_s9   ;;  %s381_s11 = sadd.s32 4294967294, %s535_s9   ;;  %s535_s9 = sphi %s556_s9, %s691_s9   ;;  %s531_s8 = sphi %s554_s8, %s690_s8   ;;  %s527_s7 = sphi %s552_s7, %s689_s7   ;;  %s523_s6 = sphi %s550_s6, %s688_s6  }
   0x4   : > { %s575_s12 = sadd.s32 1, %s535_s9   ;;  %s47_s13 = sadd.s32 1, %s531_s8 }
   0x5   : > { %s44_s14 = ssub.s32 %s535_s9, %s575_s12  ;;  %p57_p0 = scmp.ne.s32.totalorder %s531_s8, %s527_s7 }
   0x6   : > { %p45_p1 = scmp.eq.s32.totalorder %s44_s14, 0  ;;  %p58_p2 = scmp.eq.s32.totalorder %s571_s10, 1 }
   0x7   : > { %p63_p3 = scmp.ne.s32.totalorder %s527_s7, %s523_s6  ;;  %p64_p4 = scmp.eq.s32.totalorder %s381_s11, 1 }
   0x8   : > { %s586_s15 = scalar_select %p45_p1, %s531_s8, %s47_s13  }
   0x9   : > { %p588_p5 = por %p58_p2, %p57_p0  ;;  %p592_p6 = por %p64_p4, %p63_p3 }
   0xa   : > { %p384_p7 = scmp.ge.s32.totalorder %s535_s9, 1  ;;  %p90_p8 = scmp.lt.s32.totalorder %s535_s9, 3 }
   0xc   : > { %p91_p9 = pnand %p384_p7, %p90_p8 }
   0xd   : > { %p110_p10 = scmp.lt.s32.totalorder (!%p91_p9), %s571_s10, 1  ;;  %s107_s23 = sand.u32 (!%p91_p9), 1, %s527_s7  }
   0xe   : > { %94 = sbr.rel (%p91_p9) target bundleno = 314 (0x13a), region = 24  ;;  %s385_s24 = sshll.u32 (!%p91_p9), %s107_s23, 5 }
   0xf   : > { %s402_s25 = sshll.u32 (!%p91_p9), %s571_s10, 9  ;;  %s109_s26 = scalar_lea.vmem (!%p91_p9), [#allocation2], %s385_s24 }
  0x10   : > { %s319_s27 = sshll.u32 (!%p91_p9), %s109_s26, 4  ;;  %s634_s30 = scalar_lea.hbm (!%p91_p9), %s685_s1, %s402_s25  ;;  %s636_s27 = int_to_ptr.vmem [resolvable:$true] %s319_s27 }
  0x11   : > { %s644_s2 = scalar_lea.sflag (!%p91_p9), [#allocation3], %s107_s23  ;;  %s475_s3 = scalar_lea.vmem (!%p91_p9), %s636_s27, 512 }
  0x12   : > { %p476_p11 = scmp.ne.s32.totalorder (!%p91_p9), %s636_s27, %s475_s3  ;;  %s537_s4 = smov (!%p91_p9), [#allocation2]  }
  0x13   : > { %s111_s18 = scalar_select %p110_p10, %s571_s10, 1  ;;  %vm123_vm0 = vcmask 31744   ;;  %v265_v16 = vlaneseq  ;;  %vm300_vm1 = vcmask 261120  }
  0x14   : > { %p477_p12 = pnand %p476_p11, %p588_p5  ;;  %s479_s5 = sshll.u32 %s537_s4, 4  ;;  %s480_s5 = int_to_ptr.vmem [resolvable:$false] %s479_s5 }
  0x15   : > { %s401_s19 = sshll.u32 %s111_s18, 5  ;;  %v266_v17 = vshrl.u32 %v265_v16, 7  ;;  %v287_v23 = vand.u32 127, %v265_v16  ;;  %s481_s10 = scalar_lea.vmem %s480_s5, 1024 }
  0x16   : > { %s114_s22 = scalar_lea.vmem %s684_s0, %s401_s19  ;;  %p478_p13 = pneg %p477_p12 }
  0x17   : > { %v115_v0 = vld [vmem:[%s114_s22] sm:$0xff]  ;;  %v116_v1 = vld [vmem:[%s114_s22 + $0x8] sm:$0xff]  ;;  %v117_v2 = vld [vmem:[%s114_s22 + $0x10] sm:$0xff]  ;;  %v267_v20 = vsub.s32 0, %v266_v17  ;;  %v283_v25 = vadd.s32 8, %v266_v17  ;;  %v284_v26 = vadd.s32 16, %v266_v17  ;;  %vm288_vm2 = vcmp.eq.s32.totalorder %v266_v17, %v287_v23  ;;  %p482_p0 = scmp.lt.s32.totalorder %s636_s27, %s480_s5  ;;  %p483_p1 = scmp.lt.s32.totalorder %s481_s10, %s475_s3 }
  0x18   : > { %v119_v3 = vmul.f32 %v115_v0, %v115_v0  ;;  %v120_v4 = vmul.f32 %v116_v1, %v116_v1  ;;  %v121_v5 = vmul.f32 %v117_v2, %v117_v2  ;;  %v118_v6 = vld [vmem:[%s114_s22 + $0x18] sm:$0xff]  ;;  %419 = vmatprep.mubr.msk.f32.mxu0 %vm123_vm0, %v115_v0  ;;  %422 = vmatprep.mubr.msk.f32.mxu1 %vm123_vm0, %v117_v2  ;;  %v285_v27 = vadd.s32 24, %v266_v17 }
  0x19   : > { %v122_v7 = vmul.f32 %v118_v6, %v118_v6  ;;  %411 = vmatprep.subr.msk.mxu0 %vm123_vm0, %v118_v6  ;;  %425 = vmatprep.subr.msk.mxu1 %vm123_vm0, %v118_v6  ;;  %vm289_vm3 = vcmp.eq.s32.totalorder %v283_v25, %v287_v23  ;;  %vm290_vm4 = vcmp.eq.s32.totalorder %v284_v26, %v287_v23  ;;  %p484_p2 = por %p483_p1, %p482_p0 }
  0x1a   : > { %v124_v8 = vsel %vm123_vm0, %v119_v3, 0.0  ;;  %v130_v9 = vsel %vm123_vm0, %v121_v5, 0.0  ;;  %412 = vmatpush3.xpose.msk.msra.mxu0 %vm123_vm0, %v118_v6  ;;  %429 = vmatpush3.xpose.msk.msra.mxu1 %vm123_vm0, %v118_v6  ;;  %v127_v10 = vsel %vm123_vm0, %v120_v4, 0.0  ;;  %vm291_vm5 = vcmp.eq.s32.totalorder %v285_v27, %v287_v23 }
  0x1b   : > { %125 = vadd.xlane.f32.xlu0 %v124_v8  ;;  %131 = vadd.xlane.f32.xlu1 %v130_v9  ;;  %v133_v11 = vsel %vm123_vm0, %v122_v7, 0.0  ;;  %p485_p3 = pnand %p484_p2, %p478_p13 }
  0x1c   : > { %413 = vmatprep.subr.msk.mxu0 %vm123_vm0, %v117_v2  ;;  %426 = vmatprep.subr.msk.mxu1 %vm123_vm0, %v117_v2 }
  0x1e   : > { %414 = vmatpush3.xpose.msk.msra.mxu0 %vm123_vm0, %v117_v2  ;;  %430 = vmatpush3.xpose.msk.msra.mxu1 %vm123_vm0, %v117_v2 }
  0x1f   : > { %128 = vadd.xlane.f32.xlu0 %v127_v10  ;;  %134 = vadd.xlane.f32.xlu1 %v133_v11 }
  0x20   : > { %415 = vmatprep.subr.msk.mxu0 %vm123_vm0, %v116_v1  ;;  %427 = vmatprep.subr.msk.mxu1 %vm123_vm0, %v116_v1 }
  0x22   : > { %416 = vmatpush3.xpose.msk.msra.mxu0 %vm123_vm0, %v116_v1  ;;  %431 = vmatpush3.xpose.msk.msra.mxu1 %vm123_vm0, %v116_v1 }
  0x23   : > { %417 = vmatprep.subr.msk.mxu0 %vm123_vm0, %v115_v0  ;;  %428 = vmatprep.subr.msk.mxu1 %vm123_vm0, %v115_v0 }
  0x26   : > { %418 = vmatpush3.xpose.msk.msra.mxu0 %vm123_vm0, %v115_v0  ;;  %432 = vmatpush3.xpose.msk.msra.mxu1 %vm123_vm0, %v115_v0 }
  0x29   : > { %420 = vmatmul.mubr.msk.f32.vlgmr.msra.gmra.mxu0 %vm123_vm0, %v116_v1  ;;  %423 = vmatmul.mubr.msk.f32.vlgmr.msra.gmra.mxu1 %vm123_vm0, %v118_v6 }
  0xa4   : > { %v126_v12 = vpop.xlane.xlu0 %125  ;;  %v132_v14 = vpop.xlane.xlu1 %131 }
  0xa5   : > { %233 = vxpose.xlu0.b32.start [1/4] (short) (narrow) %v126_v12, 8 }
  0xa8   : > { %v129_v13 = vpop.xlane.xlu0 %128  ;;  %v135_v15 = vpop.xlane.xlu1 %134 }
  0xa9   : > { %234 = vxpose.xlu0.b32.cont [2/4] (short) (narrow) %v129_v13, 8 }
  0xad   : > { %235 = vxpose.xlu0.b32.cont [3/4] (short) (narrow) %v132_v14, 8 }
  0xb1   : > { %236 = vxpose.xlu0.b32.end [4/4] (short) (narrow) %v135_v15, 8 }
  0xe9   : > { %v421_v18 = vpop.f32.mrf.mxu0  ;;  %v424_v19 = vpop.f32.mrf.mxu1 }
  0xea   : > { %v274_v29 = vmul.f32 2.0, %v421_v18  ;;  %v276_v30 = vmul.f32 2.0, %v424_v19 }
  0xeb   : > { %v214_v21 = vpop.f32.mrf.mxu0  ;;  %v224_v22 = vpop.f32.mrf.mxu1 }
  0xec   : > { %v273_v31 = vmul.f32 2.0, %v214_v21  ;;  %v275_v32 = vmul.f32 2.0, %v224_v22 }
 0x121   : > { %v249_v24 = vpop.trf.xlu0 }
 0x122   : > { %v268_v28 = vrot.slane %v249_v24, %v267_v20 }
 0x124   : > { %v269_v33 = vadd.f32 %v268_v28, %v126_v12  ;;  %v270_v34 = vadd.f32 %v268_v28, %v129_v13  ;;  %v271_v35 = vadd.f32 %v268_v28, %v132_v14  ;;  %v272_v36 = vadd.f32 %v268_v28, %v135_v15 }
 0x126   : > { %v277_v37 = vsub.f32 %v269_v33, %v273_v31  ;;  %v278_v38 = vsub.f32 %v270_v34, %v274_v29  ;;  %v279_v39 = vsub.f32 %v271_v35, %v275_v32  ;;  %v280_v40 = vsub.f32 %v272_v36, %v276_v30 }
 0x128   : > { %v292_v41 = vmax.f32 %v277_v37, 0.0  ;;  %v293_v42 = vmax.f32 %v278_v38, 0.0  ;;  %v294_v43 = vmax.f32 %v279_v39, 0.0  ;;  %v295_v44 = vmax.f32 %v280_v40, 0.0 }
 0x12a   : > { %v296_v45 = vsel %vm288_vm2, inf, %v292_v41  ;;  %v297_v46 = vsel %vm289_vm3, inf, %v293_v42  ;;  %v298_v47 = vsel %vm290_vm4, inf, %v294_v43  ;;  %v299_v48 = vsel %vm291_vm5, inf, %v295_v44 }
 0x12b   : > { %301 = vst.msk [vmem:[%s109_s26] sm:$0xff] %vm300_vm1, %v296_v45  ;;  %302 = vst.msk [vmem:[%s109_s26 + $0x8] sm:$0xff] %vm300_vm1, %v297_v46 }
 0x12c   : > { %303 = vst.msk [vmem:[%s109_s26 + $0x10] sm:$0xff] %vm300_vm1, %v298_v47  ;;  %304 = vst.msk [vmem:[%s109_s26 + $0x18] sm:$0xff] %vm300_vm1, %v299_v48 }
 0x12d   : > { %488 = shalt.err (!%p485_p3)
}
 0x12e   : > { %s489_s11 = scalar_lea.hbm %s634_s30, 512  ;;  %s493_s18 = scalar_lea.hbm %s685_s1, 1024 }
 0x12f   : > { %p490_p4 = scmp.ne.s32.totalorder %s634_s30, %s489_s11  ;;  %p494_p9 = scmp.lt.s32.totalorder %s634_s30, %s685_s1 }
 0x130   : > { %p495_p10 = scmp.lt.s32.totalorder %s493_s18, %s489_s11 }
 0x131   : > { %p491_p7 = pnand %p490_p4, %p588_p5 }
 0x132   : > { %p496_p11 = por %p495_p10, %p494_p9 }
 0x133   : > { %p492_p8 = pneg %p491_p7 }
 0x135   : > { %p497_p12 = pnand %p496_p11, %p492_p8 }
 0x137   : > { %500 = shalt.err (!%p497_p12)
}
 0x138   : > { %s538_s21 = smov 128   ;;  %s539_s22 = smov 8  }
 0x139   : > { %433 = dma.vmem_to_hbm [thread:$0]  (%p588_p5), %s636_s27, 512, %s634_s30, %s644_s2, %s538_s21, %s538_s21, %s539_s22  }
 0x13a PF: > { %p439_p13 = scmp.ge.s32.totalorder %s535_s9, 2  ;;  %s334_s23 = sand.u32 1, %s523_s6  }
 0x13b   : > { %s335_s24 = scalar_lea.sflag [#allocation3], %s334_s23 }
 0x13c   : > { %p436_p0 = pnand %p439_p13, %p592_p6 }
 0x13e   : > { %p437_p1 = pneg %p436_p0 }
 0x140   : > { %518 = dma.done.wait (%p437_p1), %s335_s24, 512  }
 0x141   : > { %520 = vsyncadd (%p437_p1), %s335_s24, 4294966784  ;;  %p11_p2 = scmp.ge.s32.totalorder %s575_s12, 4   ;;  %s688_s6 = smov %s527_s7 }
 0x142   : > { %s689_s7 = smov %s531_s8  ;;  %s690_s8 = smov %s586_s15 }
 0x143   : > { %s691_s9 = smov %s575_s12  ;;  %13 = sbr.rel (!%p11_p2) target bundleno = 3 (0x3), region = 59 }
 0x148   :  { %340 = vsyncpa [#allocation3], 1 }
 0x149   :  { %342 = vsyncpa [#allocation3 + $0x1], 1 }

</bundles_post_ra>
